<compile_context>
chip_gen: v7x
topology: tpu7x:2x2x1
jax: 0.10.0
libtpu: 0.0.40
codegen_flags: <defaults>
</compile_context>

<pallas_src>
import functools

import numpy as np

import jax
import jax.numpy as jnp
from jax import lax
from jax.experimental import pallas as pl
from jax.experimental.pallas import tpu as pltpu


def _cdiv(a, b):
    return -(-a // b)


def _round_up(a, m):
    return _cdiv(a, m) * m


def _vmem_capacity_bytes():
    try:
        return int(pltpu.get_tpu_info().vmem_capacity_bytes)
    except Exception:
        return 64 * 1024 * 1024          # conservative fallback (v7x: 64 MiB/TC)


# -----------------------------------------------------------------------------
# Glue: bilinear resize matching torch.nn.functional.interpolate(
#        mode='bilinear', align_corners=False)
# -----------------------------------------------------------------------------
def _bilinear_resize_nchw(x, out_h, out_w):
    # TODO(synk): gather-based label resize; switch to two interpolation-matrix
    # matmuls only if a trace ever shows it as non-trivial (labels are tiny).
    _, _, in_h, in_w = x.shape

    def src(out_size, in_size):
        scale = in_size / out_size
        i = jnp.arange(out_size, dtype=jnp.float32)
        s = jnp.maximum((i + 0.5) * scale - 0.5, 0.0)
        i0 = jnp.minimum(jnp.floor(s).astype(jnp.int32), in_size - 1)
        i1 = jnp.minimum(i0 + 1, in_size - 1)
        frac = s - i0.astype(jnp.float32)
        return i0, i1, frac

    h0, h1, fh = src(out_h, in_h)
    w0, w1, fw = src(out_w, in_w)
    x_h0 = x[:, :, h0, :]
    x_h1 = x[:, :, h1, :]
    x00 = x_h0[:, :, :, w0]
    x01 = x_h0[:, :, :, w1]
    x10 = x_h1[:, :, :, w0]
    x11 = x_h1[:, :, :, w1]
    fh = fh[None, None, :, None]
    fw = fw[None, None, None, :]
    top = x00 * (1.0 - fw) + x01 * fw
    bot = x10 * (1.0 - fw) + x11 * fw
    return top * (1.0 - fh) + bot * fh


# -----------------------------------------------------------------------------
# Kernel 1: per-image, per-class masked spatial sum, cdiv-tiled over HW
# -----------------------------------------------------------------------------
def _prototype_kernel(hw, n_k_per_split, mask_tail,
                      feat_ref, lab_ref, proto_ref):
    # feat_ref : (1, D, T) f32  -- native NCHW slab, HW tile on lanes (no cast)
    # lab_ref  : (1, 1, T) i32  -- resized labels, same HW tile
    # proto_ref: (1, D, C_pad) f32 -- grid-resident accumulator over the HW axis
    k = pl.program_id(2)

    @pl.when(k == 0)
    def _init():
        proto_ref[...] = jnp.zeros_like(proto_ref)

    feat = feat_ref[0]                                    # (D, T) f32
    lab = lab_ref[0]                                      # (1, T) i32
    t = feat.shape[1]
    c_pad = proto_ref.shape[2]

    cls_ids = lax.broadcasted_iota(jnp.int32, (c_pad, t), 0)
    onehot = lab == cls_ids                               # (C_pad, T) bool

    if mask_tail:                     # static: HW is not a multiple of the tile
        g = pl.program_id(1) * n_k_per_split + k          # global HW-tile index
        col = g * t + lax.broadcasted_iota(jnp.int32, (1, t), 1)
        valid = col < hw                                  # (1, T)
        onehot = jnp.logical_and(onehot, valid)
        # OOB feature lanes are uninitialized (could be NaN/Inf): select, do
        # not rely on multiply-by-zero.
        feat = jnp.where(valid, feat, 0.0)

    # einsum('dhw,hw->d') for all classes at once on the MXU, f32 in / f32 acc
    # (matches the torch reference's f32 accumulation; the kernel is HBM-bound
    # so the extra f32 MXU passes are hidden under the feature DMA).
    proto_ref[0] += lax.dot_general(
        feat, onehot.astype(jnp.float32), (((1,), (1,)), ((), ())),
        preferred_element_type=jnp.float32)


# -----------------------------------------------------------------------------
# Kernel 2: per-class Gram slice + soft-target cross entropy (generic path)
# -----------------------------------------------------------------------------
def _contrast_loss_kernel(inv_temp, fill, num_classes, b_pad,
                          proto_ref, vrow_ref, vcol_ref, ccls_ref, loss_ref):
    # proto_ref: (N, D) f32, N = C*b_pad, class-major, zero-padded rows
    # vrow_ref : (1, N) f32 validity (class present in image & not ignored)
    # vcol_ref : (N, 1) f32 same validity, column layout
    # ccls_ref : (1, N) i32 class id of each prototype slot
    # loss_ref : (1, 1) f32 SMEM
    v_row = vrow_ref[...]
    ccls = ccls_ref[...]
    neg = jnp.float32(-1e30)

    def body(c, total):
        start = pl.multiple_of(c * b_pad, 8)
        # class-c rows of the (temperature-scaled) Gram matrix, computed on the
        # fly: O(b_pad * N) live values instead of an O(N^2) VMEM scratch.
        lhs = proto_ref[pl.ds(start, b_pad), :] * inv_temp        # (b_pad, D)
        sub = lax.dot_general(lhs, proto_ref[...], (((1,), (1,)), ((), ())),
                              preferred_element_type=jnp.float32)  # (b_pad, N)

        pos_r = vcol_ref[pl.ds(start, b_pad), :]                  # (b_pad, 1)
        pos_c = jnp.where(ccls == c, v_row, 0.0)                  # (1, N)
        n_c = jnp.sum(pos_c)

        # multiplicity of each Gram entry in concat([p_logits, n_logits]):
        # pos-pos pairs appear in both parts (x2), pos-valid pairs once.
        w = pos_r * (v_row + pos_c)                               # (b_pad, N)
        masked = jnp.where(w > 0.0, sub, neg)
        m = jnp.max(masked)
        denom = jnp.maximum(jnp.sum(w * jnp.exp(masked - m)), 1e-30)
        lse = m + jnp.log(denom)

        # soft-target CE over the single logits row: sum_j t_j * (lse - logit_j)
        # with t_j == fill on the n_c^2 positive columns, 0 elsewhere.
        ce = fill * (n_c * n_c * lse - jnp.sum((pos_r * pos_c) * sub))
        return total + jnp.where(n_c > 0.0, ce, jnp.float32(0.0))

    loss_ref[0, 0] = lax.fori_loop(0, num_classes, body, jnp.float32(0.0))


# -----------------------------------------------------------------------------
# Wrapper: prototypes
# -----------------------------------------------------------------------------
def _compute_prototypes(features, labels, *, num_classes, ignore_label=()):
    """Returns (normalized per-image class prototypes (B, D, C), validity (B, C))."""
    b, d, h, w = features.shape
    hw = h * w

    # labels.unsqueeze(1).float() -> bilinear interpolate -> squeeze -> .long()
    lab_f = _bilinear_resize_nchw(labels[:, None].astype(jnp.float32), h, w)
    lab_i = lab_f[:, 0].astype(jnp.int32)      # trunc toward 0 (labels >= 0)
    lab_flat = lab_i.reshape(b, 1, hw)

    # native NCHW: (B,D,H,W) -> (B,D,HW) is a free reshape; stream f32 straight
    # into the kernel (no wrapper-side bf16 materialization pass).
    feat_bdhw = features.reshape(b, d, hw)

    # lane-dense class axis (padded to a multiple of 128), sliced off afterwards.
    c_pad = _round_up(max(num_classes, 1), 128)

    # --- generation-aware tiling / VMEM budgets -----------------------------
    vmem_cap = _vmem_capacity_bytes()              # 64 MiB (v7x) / 128 MiB (v5e/v6e)
    vmem_limit = int(min(vmem_cap * 3 // 4, 64 * 1024 * 1024))
    # rough per-HW-column VMEM bytes: double-buffered f32 features + labels +
    # the materialized f32 one-hot / iota intermediates; keep ~2x headroom.
    per_col = 8 * d + 12 * c_pad + 16
    tile_hw = max(128, ((vmem_limit // 2) // per_col) // 128 * 128)
    # keep >= 2 HW steps when possible so double-buffering actually pipelines.
    tile_hw = min(tile_hw, max(128, _round_up(_cdiv(hw, 2), 128)))
    if hw < 128:
        tile_hw = hw                               # tiny input: one full block
    n_k_total = _cdiv(hw, tile_hw)

    # v7x megacore: with B == 1 the batch axis cannot be sharded across the two
    # TensorCores, so split the HW reduction into two parallel half-ranges.
    n_split = 2 if (b == 1 and n_k_total >= 2) else 1
    n_k = _cdiv(n_k_total, n_split)
    mask_tail = (n_split * n_k * tile_hw) != hw

    def _in_map(i, s, k):
        # clamp: fully-out-of-range programs re-read the last block and are
        # zeroed by the in-kernel tail mask.
        return (i, 0, jnp.minimum(s * n_k + k, n_k_total - 1))

    def _out_map(i, s, k):
        return (i * n_split + s, 0, 0)

    kernel = functools.partial(_prototype_kernel, hw, n_k, bool(mask_tail))
    protos_raw = pl.pallas_call(
        kernel,
        grid=(b, n_split, n_k),
        in_specs=[
            pl.BlockSpec((1, d, tile_hw), _in_map),
            pl.BlockSpec((1, 1, tile_hw), _in_map),
        ],
        out_specs=pl.BlockSpec((1, d, c_pad), _out_map),
        out_shape=jax.ShapeDtypeStruct((b * n_split, d, c_pad), jnp.float32),
        compiler_params=pltpu.CompilerParams(
            dimension_semantics=("parallel", "parallel", "arbitrary"),
            vmem_limit_bytes=vmem_limit),
    )(feat_bdhw, lab_flat)

    protos_raw = protos_raw.reshape(b, n_split, d, c_pad).sum(axis=1)
    protos_raw = protos_raw[:, :, :num_classes]                   # (B, D, C)

    # F.normalize(dim=-1): v / max(||v||, 1e-12)  -- tiny epilogue
    norm = jnp.sqrt(jnp.sum(protos_raw * protos_raw, axis=1, keepdims=True))
    protos_n = protos_raw / jnp.maximum(norm, 1e-12)

    # class presence via a tiny wrapper-side label histogram (labels are 4 B/px
    # -- essentially free); ignored classes never get prototypes.
    counts = jnp.sum(
        lab_i.reshape(b, hw, 1)
        == jnp.arange(num_classes, dtype=jnp.int32)[None, None, :],
        axis=1)                                                    # (B, C)
    keep = np.ones((num_classes,), dtype=bool)
    for ig in ignore_label:
        ig = int(ig)
        if 0 <= ig < num_classes:
            keep[ig] = False
    # TODO(synk): negative ignore labels can bilinear-blend into class 0 before
    # they could be ignored -- same behavior as the torch reference.
    valid = (counts > 0) & jnp.asarray(keep)[None, :]
    return protos_n, valid


# -----------------------------------------------------------------------------
# Wrapper: full forward
# -----------------------------------------------------------------------------
def prototype_contrast_loss(features, labels, *, temperature, num_classes,
                            ignore_label=(), target_fill=0.0):
    """Forward pass of prototypeContrastLoss.

    features: (B, D, H, W) float32 (NCHW);  labels: (B, H0, W0) int.
    """
    protos_n, valid = _compute_prototypes(
        features, labels, num_classes=num_classes, ignore_label=ignore_label)
    b, d, _ = protos_n.shape

    # TODO(synk): the reference calls F.cross_entropy with a (1, n^2) probability
    # target (torch.zeros) against (1, n^2 + n*N) logits, which raises in PyTorch
    # when the sizes differ; the only coherent extension (zero-pad the all-zero
    # target) makes every CE term exactly 0, so the Gram/CE kernel is skipped at
    # the Python level unless a nonzero `target_fill` is requested.
    if float(target_fill) == 0.0:
        return jnp.zeros((), jnp.float32)

    # class-major layout, each class block padded to a sublane multiple so the
    # kernel slices its positive rows with an 8-aligned pl.ds.
    b_pad = max(8, _round_up(b, 8))
    n = num_classes * b_pad
    protos_cm = jnp.transpose(protos_n, (2, 0, 1))                # (C, B, D)
    protos_cm = jnp.pad(protos_cm, ((0, 0), (0, b_pad - b), (0, 0)))
    protos_flat = protos_cm.reshape(n, d)

    valid_cm = jnp.pad(valid.T, ((0, 0), (0, b_pad - b)))         # (C, b_pad)
    v_flat = valid_cm.reshape(n).astype(jnp.float32)
    v_row = v_flat.reshape(1, n)
    v_col = v_flat.reshape(n, 1)
    cls_row = jnp.repeat(jnp.arange(num_classes, dtype=jnp.int32),
                         b_pad).reshape(1, n)

    vmem_limit = int(min(_vmem_capacity_bytes() * 3 // 4, 64 * 1024 * 1024))
    kernel = functools.partial(_contrast_loss_kernel,
                               float(1.0 / temperature), float(target_fill),
                               int(num_classes), int(b_pad))
    loss = pl.pallas_call(
        kernel,
        in_specs=[
            pl.BlockSpec(memory_space=pltpu.MemorySpace.VMEM),    # prototypes
            pl.BlockSpec(memory_space=pltpu.MemorySpace.VMEM),    # valid row
            pl.BlockSpec(memory_space=pltpu.MemorySpace.VMEM),    # valid col
            pl.BlockSpec(memory_space=pltpu.MemorySpace.VMEM),    # class ids
        ],
        out_specs=pl.BlockSpec(memory_space=pltpu.MemorySpace.SMEM),
        out_shape=jax.ShapeDtypeStruct((1, 1), jnp.float32),
        compiler_params=pltpu.CompilerParams(vmem_limit_bytes=vmem_limit),
    )(protos_flat, v_row, v_col, cls_row)
    return loss[0, 0]


# -----------------------------------------------------------------------------
# Pure-JAX / numpy references for self-checks
# -----------------------------------------------------------------------------
def _ref_prototypes(features, labels, num_classes):
    b, d, h, w = features.shape
    lab = _bilinear_resize_nchw(labels[:, None].astype(jnp.float32),
                                h, w)[:, 0].astype(jnp.int32)
    onehot = (lab[:, None, :, :]
              == jnp.arange(num_classes, dtype=jnp.int32)[None, :, None, None]
              ).astype(jnp.float32)                                # (B,C,H,W)
    protos = jnp.einsum('bdhw,bchw->bdc', features, onehot)
    counts = jnp.sum(onehot, axis=(2, 3))
    norm = jnp.sqrt(jnp.sum(protos * protos, axis=1, keepdims=True))
    return protos / jnp.maximum(norm, 1e-12), counts > 0


def _ref_contrast_loss(protos_n, valid, temperature, fill, num_classes):
    # numpy reference for the zero-padded soft-target extension.
    b = protos_n.shape[0]
    protos, cls_of = [], []
    for c in range(num_classes):
        for i in range(b):
            if valid[i, c]:
                protos.append(np.asarray(protos_n[i, :, c], dtype=np.float64))
                cls_of.append(c)
    if not protos:
        return 0.0
    P = np.stack(protos)
    cls_of = np.asarray(cls_of)
    total = 0.0
    for c in range(num_classes):
        rows = np.where(cls_of == c)[0]
        if rows.size == 0:
            continue
        Pc = P[rows]
        p_logits = (Pc @ Pc.T).reshape(-1)
        n_logits = (Pc @ P.T).reshape(-1)
        logits = np.concatenate([p_logits, n_logits]) / temperature
        tgt = np.zeros_like(logits)
        tgt[: p_logits.size] = fill
        m = logits.max()
        lse = m + np.log(np.exp(logits - m).sum())
        total += float((tgt * (lse - logits)).sum())
    return total


if __name__ == "__main__":
    key = jax.random.PRNGKey(0)
    k_feat, k_lab, k_feat1, k_lab1 = jax.random.split(key, 4)

    B, D, H, W = 2, 32, 18, 18           # HW=324: exercises the cdiv tail mask
    NUM_CLASSES = 4
    TEMPERATURE = 0.1

    features = jax.random.normal(k_feat, (B, D, H, W), dtype=jnp.float32)
    labels = jax.random.randint(k_lab, (B, 2 * H, 2 * W), 0, NUM_CLASSES,
                                dtype=jnp.int32)

    # 1) reference semantics: literal torch.zeros soft target -> loss == 0,
    #    the Gram/CE kernel is skipped at the Python level.
    loss = prototype_contrast_loss(features, labels, temperature=TEMPERATURE,
                                   num_classes=NUM_CLASSES, ignore_label=())
    jax.block_until_ready(loss)
    assert bool(jnp.isfinite(loss)) and float(loss) == 0.0

    # 2) prototype kernel vs pure-JAX reference (masking / layout check).
    protos_n, valid = _compute_prototypes(features, labels,
                                          num_classes=NUM_CLASSES,
                                          ignore_label=())
    ref_protos, ref_valid = _ref_prototypes(features, labels, NUM_CLASSES)
    jax.block_until_ready(protos_n)
    assert np.allclose(np.asarray(protos_n), np.asarray(ref_protos), atol=2e-2)
    assert np.array_equal(np.asarray(valid), np.asarray(ref_valid))

    # 3) generic nonzero soft-target fill exercises the contrast-loss kernel.
    fill = 0.3
    loss_g = prototype_contrast_loss(features, labels, temperature=TEMPERATURE,
                                     num_classes=NUM_CLASSES, ignore_label=(),
                                     target_fill=fill)
    jax.block_until_ready(loss_g)
    ref_g = _ref_contrast_loss(np.asarray(protos_n), np.asarray(valid),
                               TEMPERATURE, fill, NUM_CLASSES)
    assert abs(float(loss_g) - ref_g) <= 1e-3 + 1e-3 * abs(ref_g)

    # 4) B == 1 path (HW reduction split across the two v7x TensorCores).
    feats1 = jax.random.normal(k_feat1, (1, D, H, W), dtype=jnp.float32)
    labs1 = jax.random.randint(k_lab1, (1, 2 * H, 2 * W), 0, NUM_CLASSES,
                               dtype=jnp.int32)
    p1, _ = _compute_prototypes(feats1, labs1, num_classes=NUM_CLASSES,
                                ignore_label=())
    rp1, _ = _ref_prototypes(feats1, labs1, NUM_CLASSES)
    jax.block_until_ready(p1)
    assert np.allclose(np.asarray(p1), np.asarray(rp1), atol=2e-2)

    print("KERNEL_OK")
</pallas_src>

<mosaic_0001>
module attributes {stable_mosaic.version = 11 : i64} {
  func.func @_prototype_kernel(%arg0: i32, %arg1: i32, %arg2: i32, %arg3: memref<1x32x256xf32, #tpu.memory_space<vmem>>, %arg4: memref<1x1x256xi32, #tpu.memory_space<vmem>>, %arg5: memref<1x32x128xf32, #tpu.memory_space<vmem>>) attributes {dimension_semantics = [#tpu.dimension_semantics<parallel>, #tpu.dimension_semantics<parallel>, #tpu.dimension_semantics<arbitrary>], iteration_bounds = array<i64: 2, 1, 2>, scalar_prefetch = 0 : i64, scratch_operands = 0 : i64, tpu.core_type = #tpu.core_type<tc>, window_params = [{transform_indices = @transform_0, window_bounds = array<i64: 1, 32, 256>}, {transform_indices = @transform_1, window_bounds = array<i64: 1, 1, 256>}, {transform_indices = @transform_2, window_bounds = array<i64: 1, 32, 128>}]} {
    %c0_i32 = arith.constant 0 : i32
    %0 = arith.cmpi eq, %arg2, %c0_i32 : i32
    %1 = arith.extui %0 : i1 to i32
    %c0_i32_0 = arith.constant 0 : i32
    %2 = arith.cmpi ne, %1, %c0_i32_0 : i32
    scf.if %2 {
      %cst_13 = arith.constant 0.000000e+00 : f32
      %33 = vector.broadcast %cst_13 : f32 to vector<1x32x128xf32>
      %c0_14 = arith.constant 0 : index
      %c0_15 = arith.constant 0 : index
      %c0_16 = arith.constant 0 : index
      %34 = vector.load %arg5[%c0_14, %c0_15, %c0_16] : memref<1x32x128xf32, #tpu.memory_space<vmem>>, vector<1x32x128xf32>
      tpu.vector_store %arg5[%c0_14, %c0_15, %c0_16], %33 {strides = array<i32>} : memref<1x32x128xf32, #tpu.memory_space<vmem>>, vector<1x32x128xf32>,
    } else {
    }
    %c0 = arith.constant 0 : index
    %c0_1 = arith.constant 0 : index
    %c0_2 = arith.constant 0 : index
    %3 = vector.load %arg3[%c0, %c0_1, %c0_2] : memref<1x32x256xf32, #tpu.memory_space<vmem>>, vector<1x32x256xf32>
    %4 = vector.shape_cast %3 : vector<1x32x256xf32> to vector<32x256xf32>
    %c0_3 = arith.constant 0 : index
    %c0_4 = arith.constant 0 : index
    %c0_5 = arith.constant 0 : index
    %5 = vector.load %arg4[%c0_3, %c0_4, %c0_5] : memref<1x1x256xi32, #tpu.memory_space<vmem>>, vector<1x1x256xi32>
    %6 = vector.shape_cast %5 : vector<1x1x256xi32> to vector<1x256xi32>
    %7 = tpu.iota {dimensions = array<i32: 0>} : vector<128x256xi32>
    %8 = vector.broadcast %6 : vector<1x256xi32> to vector<128x256xi32>
    %9 = arith.cmpi eq, %8, %7 : vector<128x256xi32>
    %c2_i32 = arith.constant 2 : i32
    %10 = arith.muli %arg1, %c2_i32 : i32
    %11 = arith.addi %10, %arg2 : i32
    %c256_i32 = arith.constant 256 : i32
    %12 = arith.muli %11, %c256_i32 : i32
    %13 = tpu.iota {dimensions = array<i32: 1>} : vector<1x256xi32>
    %14 = vector.broadcast %12 : i32 to vector<1x256xi32>
    %15 = arith.addi %14, %13 : vector<1x256xi32>
    %c324_i32 = arith.constant 324 : i32
    %16 = vector.broadcast %c324_i32 : i32 to vector<1x256xi32>
    %17 = arith.cmpi slt, %15, %16 : vector<1x256xi32>
    %18 = vector.broadcast %17 : vector<1x256xi1> to vector<128x256xi1>
    %19 = arith.andi %9, %18 : vector<128x256xi1>
    %cst = arith.constant 0.000000e+00 : f32
    %20 = vector.shape_cast %17 : vector<1x256xi1> to vector<1x256xi1>
    %21 = vector.broadcast %20 : vector<1x256xi1> to vector<32x256xi1>
    %22 = vector.broadcast %cst : f32 to vector<32x256xf32>
    %23 = arith.select %21, %4, %22 : vector<32x256xi1>, vector<32x256xf32>
    %c0_6 = arith.constant 0 : index
    %c0_7 = arith.constant 0 : index
    %c0_8 = arith.constant 0 : index
    %24 = vector.load %arg5[%c0_6, %c0_7, %c0_8] : memref<1x32x128xf32, #tpu.memory_space<vmem>>, vector<1x32x128xf32>
    %25 = vector.shape_cast %24 : vector<1x32x128xf32> to vector<32x128xf32>
    %26 = arith.extui %19 : vector<128x256xi1> to vector<128x256xi32>
    %27 = arith.sitofp %26 : vector<128x256xi32> to vector<128x256xf32>
    %cst_9 = arith.constant dense<0.000000e+00> : vector<32x128xf32>
    %28 = tpu.matmul %23, %27, %cst_9 {dimension_numbers = #tpu.dot_dimension_numbers<[1], [1], [0], [0], [0, 0, 1, 0], [], []>} : vector<32x256xf32>, vector<128x256xf32>, vector<32x128xf32> -> vector<32x128xf32>
    %29 = arith.addf %25, %28 : vector<32x128xf32>
    %c0_10 = arith.constant 0 : index
    %c0_11 = arith.constant 0 : index
    %c0_12 = arith.constant 0 : index
    %30 = vector.load %arg5[%c0_10, %c0_11, %c0_12] : memref<1x32x128xf32, #tpu.memory_space<vmem>>, vector<1x32x128xf32>
    %31 = vector.shape_cast %30 : vector<1x32x128xf32> to vector<32x128xf32>
    %32 = vector.shape_cast %29 : vector<32x128xf32> to vector<1x32x128xf32>
    tpu.vector_store %arg5[%c0_10, %c0_11, %c0_12], %32 {strides = array<i32>} : memref<1x32x128xf32, #tpu.memory_space<vmem>>, vector<1x32x128xf32>,
    return
  }
  func.func @transform_0(%arg0: i32, %arg1: i32, %arg2: i32) -> (i32, i32, i32) {
    %c2_i32 = arith.constant 2 : i32
    %0 = arith.muli %arg1, %c2_i32 : i32
    %1 = arith.addi %0, %arg2 : i32
    %c1_i32 = arith.constant 1 : i32
    %2 = arith.minsi %1, %c1_i32 : i32
    %c0_i32 = arith.constant 0 : i32
    %c0_i32_0 = arith.constant 0 : i32
    return %arg0, %c0_i32, %2 : i32, i32, i32
  }
  func.func @transform_1(%arg0: i32, %arg1: i32, %arg2: i32) -> (i32, i32, i32) {
    %c2_i32 = arith.constant 2 : i32
    %0 = arith.muli %arg1, %c2_i32 : i32
    %1 = arith.addi %0, %arg2 : i32
    %c1_i32 = arith.constant 1 : i32
    %2 = arith.minsi %1, %c1_i32 : i32
    %c0_i32 = arith.constant 0 : i32
    %c0_i32_0 = arith.constant 0 : i32
    return %arg0, %c0_i32, %2 : i32, i32, i32
  }
  func.func @transform_2(%arg0: i32, %arg1: i32, %arg2: i32) -> (i32, i32, i32) {
    %c1_i32 = arith.constant 1 : i32
    %0 = arith.muli %arg0, %c1_i32 : i32
    %1 = arith.addi %0, %arg1 : i32
    %c0_i32 = arith.constant 0 : i32
    %c0_i32_0 = arith.constant 0 : i32
    %c0_i32_1 = arith.constant 0 : i32
    return %1, %c0_i32, %c0_i32_0 : i32, i32, i32
  }
}

</mosaic_0001>

<bundles_post_ra>
// kernel: tpu_custom_call.1
= control target key start
LH: loop header
LB: loop body
LE: loop exit
PB: predicated region body
PF: predicated region fallthrough
CT: control target
= control target key end

     0   :  { %7 = vsyncpa [#allocation3], 0  ;;  %s1675_s0 = inlined_call_operand.hbm [shape: f32[2,32,324], index: 0, kind: input, shape index: {}]   ;;  %s1676_s1 = inlined_call_operand.hbm [shape: s32[2,1,324], index: 1, kind: input, shape index: {}]   ;;  %s1677_s2 = inlined_call_operand.hbm [shape: f32[2,32,128], index: 2, kind: output, shape index: {}]  }
   0x1   :  { %9 = vsyncpa [#allocation3 + $0x1], 0 }
   0x2   :  { %10 = vsyncpa [#allocation6], 0 }
   0x3   :  { %12 = vsyncpa [#allocation6 + $0x1], 0 }
   0x4   :  { %13 = vsyncpa [#allocation4], 0 }
   0x5   :  { %15 = vsyncpa [#allocation4 + $0x1], 0  ;;  %s1170_s9 = smov 0   ;;  %s1172_s10 = smov 0  }
   0x6   :  { %s1174_s11 = smov 0   ;;  %s1176_s12 = smov 0  }
   0x7   :  { %s1178_s13 = smov 0   ;;  %s1180_s14 = smov 0  }
   0x8   :  { %s1182_s15 = smov 0   ;;  %s1184_s16 = smov 0  }
   0x9   :  { %s1186_s17 = smov 0   ;;  %s1188_s18 = smov 0  }
   0xa   :  { %s1190_s19 = smov 0  }
   0xb LB: > { %1683 = sst [smem:[#allocation11_spill]] %s1112_s11  ;;  %s706_s20 = sadd.s32 4294967295, %s1144_s19   ;;  %s1144_s19 = sphi %s1190_s19, %s21_s19   ;;  %s1140_s18 = sphi %s1188_s18, %s1715_s18   ;;  %s1136_s17 = sphi %s1186_s17, %s1714_s17   ;;  %s1132_s16 = sphi %s1184_s16, %s1713_s16   ;;  %s1128_s15 = sphi %s1182_s15, %s1712_s15   ;;  %s1124_s14 = sphi %s1180_s14, %s1711_s14   ;;  %s1120_s13 = sphi %s1178_s13, %s1710_s13   ;;  %s1116_s12 = sphi %s1176_s12, %s1709_s12   ;;  %s1112_s11 = sphi %s1174_s11, %s1702_s11   ;;  %s1108_s10 = sphi %s1172_s10, %s1708_s10   ;;  %s1104_s9 = sphi %s1170_s9, %s1707_s9  }
   0xc   : > { %1684 = sst [smem:[#allocation12_spill]] %s1136_s17  ;;  %s707_s21 = sadd.s32 4294967294, %s1144_s19  }
   0xd   : > { %s33_s22 = sadd.s32 1, %s1136_s17  ;;  %s40_s23 = sadd.s32 1, %s1140_s18 }
   0xe   : > { %p34_p0 = scmp.ge.s32.totalorder %s33_s22, 2  ;;  %p46_p1 = scmp.lt.s32.totalorder %s1136_s17, 1 }
   0xf   : > { %s57_s24 = sadd.s32 1, %s1124_s14  ;;  %p64_p2 = scmp.ne.s32.totalorder %s1124_s14, %s1120_s13 }
  0x10   : > { %s1717_s22 = smov (%p34_p0, %s33_s22), 0  ;;  %s1719_s23 = smov (!%p34_p0, %s40_s23), %s1140_s18 }
  0x11   : > { %1685 = sst [smem:[#allocation13_spill]] %s1717_s22  ;;  %p42_p3 = scmp.ge.s32.totalorder %s1719_s23, 2 }
  0x12   : > { %s1237_s25 = scalar_select %p46_p1, %s1136_s17, 1 }
  0x13   : > { %p50_p4 = scmp.lt.s32.totalorder %s1717_s22, 1  ;;  %p65_p5 = scmp.eq.s32.totalorder %s1144_s19, 0 }
  0x14   : > { %p70_p6 = scmp.ne.s32.totalorder %s1120_s13, %s1116_s12  ;;  %s1721_s23 = smov (%p42_p3, %s1719_s23), 0 }
  0x15   : > { %1686 = sst [smem:[#allocation14_spill]] %s1721_s23  ;;  %s52_s27 = ssub.s32 %s1140_s18, %s1721_s23 }
  0x16   : > { %s51_s26 = scalar_select %p50_p4, %s1717_s22, 1 }
  0x17   : > { %p1248_p7 = por %p65_p5, %p64_p2  ;;  %p71_p8 = scmp.eq.s32.totalorder %s706_s20, 0 }
  0x18   : > { %s53_s29 = ssub.s32 %s1237_s25, %s51_s26  ;;  %p119_p9 = scmp.eq.s32.totalorder %s52_s27, 0 }
  0x19   : > { %s54_s30 = sor.u32 %s53_s29, %s52_s27  ;;  %p1255_p11 = por %p71_p8, %p70_p6 }
  0x1a   : > { %p55_p10 = scmp.eq.s32.totalorder %s54_s30, 0  ;;  %s121_s4 = sadd.s32 1, %s1112_s11 }
  0x1b   : > { %p131_p12 = scmp.ne.s32.totalorder %s1112_s11, %s1108_s10  ;;  %p132_p13 = scmp.eq.s32.totalorder %s706_s20, 3 }
  0x1c   : > { %s1263_s5 = scalar_select %p55_p10, %s1124_s14, %s57_s24  }
  0x1d   : > { %s1266_s6 = scalar_select %p119_p9, %s1112_s11, %s121_s4  }
  0x1e   : > { %1689 = sst [smem:[#allocation15_spill]] %s1263_s5  ;;  %p137_p0 = scmp.ne.s32.totalorder %s1108_s10, %s1104_s9 }
  0x1f   : > { %1690 = sst [smem:[#allocation16_spill]] %s1266_s6  ;;  %p138_p1 = scmp.eq.s32.totalorder %s707_s21, 3 }
  0x20   : > { %p1274_p2 = por %p132_p13, %p131_p12  ;;  %p709_p4 = scmp.ge.s32.totalorder %s1144_s19, 4 }
  0x21   : > { %p1278_p3 = por %p138_p1, %p137_p0 }
  0x22   : > { %s1691_s7 = scalar_select %p1274_p2, 1, 0 }
  0x23   : > { %s1692_s8 = scalar_select %p1278_p3, 1, 0 }
  0x24   : > { %154 = sbr.rel (%p709_p4) target bundleno = 116 (0x74), region = 16 }
  0x2b   : > { %157 = sbr.rel (!%p1248_p7) target bundleno = 80 (0x50), region = 20  ;;  %s158_s12 = sand.u32 (%p1248_p7), 1, %s1124_s14  }
  0x2c   : > { %s711_s20 = sshll.u32 (%p1248_p7), %s1237_s25, 1  ;;  %s710_s24 = sshll.u32 (%p1248_p7), %s158_s12, 6 }
  0x2d   : > { %s168_s21 = ssub.s32 (%p1248_p7), 3, %s711_s20  ;;  %s1293_s29 = scalar_lea.sflag (%p1248_p7), [#allocation3], %s158_s12 }
  0x2e   : > { %p169_p5 = scmp.lt.s32.totalorder (%p1248_p7), %s168_s21, 2  ;;  %s162_s30 = scalar_lea.vmem (%p1248_p7), [#allocation2], %s710_s24 }
  0x32   : > { %s1723_s21 = smov (!%p169_p5, %s168_s21), 2 }
  0x33   : > { %s1290_s26 = sshll.u32 %s1723_s21, 9 }
  0x34   : > { %s173_s27 = ssub.s32 1024, %s1290_s26 }
  0x35   : > { %174 = vsyncadd %s1293_s29, %s173_s27  ;;  %p713_p6 = scmp.ne.s32.totalorder %s1290_s26, 0  ;;  %s857_s4 = smul.u32 12, %s1140_s18 }
  0x36   : > { %s715_s23 = sshll.u32 %s1723_s21, 3  ;;  %s182_s22 = sshll.u32 %s162_s30, 4  ;;  %s1299_s22 = int_to_ptr.vmem [resolvable:$true] %s182_s22 }
  0x37   : > { %s177_s17 = sadd.s32 %s857_s4, %s711_s20  ;;  %s966_s20 = scalar_lea.hbm %s1675_s0, 3072 }
  0x38   : > { %s714_s5 = sshll.u32 %s177_s17, 7 }
  0x39   : > { %s1304_s12 = scalar_lea.hbm %s1675_s0, %s714_s5 }
  0x3a   : > { %s962_s24 = scalar_lea.hbm %s1304_s12, %s1290_s26  ;;  %p967_p12 = scmp.lt.u32.totalorder %s1304_s12, %s1675_s0 }
  0x3b   : > { %p963_p8 = scmp.ne.s32.totalorder %s1304_s12, %s962_s24  ;;  %p968_p13 = scmp.lt.u32.totalorder %s966_s20, %s962_s24 }
  0x3c   : > { %p970_p1 = scmp.lt.u32.totalorder %s962_s24, %s1304_s12 }
  0x3d   : > { %p964_p9 = pnand %p963_p8, %p713_p6  ;;  %p969_p0 = por %p968_p13, %p967_p12 }
  0x3f   : > { %p965_p10 = pneg %p964_p9  ;;  %p971_p4 = por %p970_p1, %p969_p0 }
  0x41   : > { %p972_p5 = pnand %p971_p4, %p965_p10 }
  0x43   : > { %975 = shalt.err (!%p972_p5)
}
  0x44   : > { %s976_s11 = scalar_lea.vmem %s1299_s22, %s1290_s26  ;;  %s1146_s5 = smov [#allocation2]  }
  0x45   : > { %p977_p8 = scmp.ne.s32.totalorder %s1299_s22, %s976_s11  ;;  %s980_s6 = sshll.u32 %s1146_s5, 4  ;;  %s981_s6 = int_to_ptr.vmem [resolvable:$false] %s980_s6 }
  0x46   : > { %s982_s27 = scalar_lea.vmem %s981_s6, 2048  ;;  %p983_p2 = scmp.lt.s32.totalorder %s1299_s22, %s981_s6 }
  0x47   : > { %p978_p9 = pnand %p977_p8, %p713_p6  ;;  %p984_p12 = scmp.lt.s32.totalorder %s982_s27, %s976_s11 }
  0x49   : > { %p979_p3 = pneg %p978_p9  ;;  %p985_p13 = por %p984_p12, %p983_p2 }
  0x4b   : > { %p986_p0 = pnand %p985_p13, %p979_p3 }
  0x4d   : > { %989 = shalt.err (!%p986_p0)
}
  0x4e   : > { %s1147_s24 = smov 384   ;;  %s1148_s30 = smov 256  }
  0x4f   : > { %188 = dma.hbm_to_vmem [thread:$0]  (%p713_p6), %s1304_s12, %s1290_s26, %s1299_s22, %s1293_s29, %s1147_s24, %s1148_s30, %s715_s23  }
  0x50 PF: > { %191 = sbr.rel (!%p1248_p7) target bundleno = 116 (0x74), region = 24  ;;  %s192_s20 = sand.u32 (%p1248_p7), 1, %s1124_s14  }
  0x51   : > { %s719_s4 = sshll.u32 (%p1248_p7), %s1237_s25, 1  ;;  %s718_s17 = sshll.u32 (%p1248_p7), %s192_s20, 1 }
  0x52   : > { %s202_s11 = ssub.s32 (%p1248_p7), 3, %s719_s4  ;;  %s1340_s27 = scalar_lea.sflag (%p1248_p7), [#allocation6], %s192_s20 }
  0x53   : > { %p203_p2 = scmp.lt.s32.totalorder (%p1248_p7), %s202_s11, 2  ;;  %s196_s22 = scalar_lea.vmem (%p1248_p7), [#allocation5], %s718_s17 }
  0x57   : > { %s1725_s11 = smov (!%p203_p2, %s202_s11), 2 }
  0x58   : > { %s1337_s5 = sshll.u32 %s1725_s11, 4 }
  0x59   : > { %s207_s6 = ssub.s32 32, %s1337_s5 }
  0x5a   : > { %208 = vsyncadd %s1340_s27, %s207_s6  ;;  %s858_s23 = smul.u32 3, %s1140_s18  ;;  %p721_p7 = scmp.ne.s32.totalorder %s1337_s5, 0 }
  0x5b   : > { %s215_s25 = sshll.u32 %s196_s22, 4  ;;  %s994_s17 = scalar_lea.hbm %s1676_s1, 96  ;;  %s1345_s25 = int_to_ptr.vmem [resolvable:$true] %s215_s25 }
  0x5c   : > { %s211_s28 = sadd.s32 %s858_s23, %s719_s4 }
  0x5d   : > { %s722_s21 = sshll.u32 %s211_s28, 4 }
  0x5e   : > { %s213_s12 = scalar_lea.hbm %s1676_s1, %s722_s21 }
  0x5f   : > { %s990_s24 = scalar_lea.hbm %s213_s12, %s1337_s5  ;;  %p995_p1 = scmp.lt.u32.totalorder %s213_s12, %s1676_s1 }
  0x60   : > { %p991_p3 = scmp.ne.s32.totalorder %s213_s12, %s990_s24  ;;  %p996_p4 = scmp.lt.u32.totalorder %s994_s17, %s990_s24 }
  0x61   : > { %p998_p8 = scmp.lt.u32.totalorder %s990_s24, %s213_s12 }
  0x62   : > { %p992_p6 = pnand %p991_p3, %p721_p7  ;;  %p997_p5 = por %p996_p4, %p995_p1 }
  0x64   : > { %p993_p10 = pneg %p992_p6  ;;  %p999_p9 = por %p998_p8, %p997_p5 }
  0x66   : > { %p1000_p12 = pnand %p999_p9, %p993_p10 }
  0x68   : > { %1003 = shalt.err (!%p1000_p12)
}
  0x69   : > { %s1004_s4 = scalar_lea.vmem %s1345_s25, %s1337_s5  ;;  %s1149_s22 = smov [#allocation5]  }
  0x6a   : > { %p1005_p13 = scmp.ne.s32.totalorder %s1345_s25, %s1004_s4  ;;  %s1008_s23 = sshll.u32 %s1149_s22, 4  ;;  %s1009_s23 = int_to_ptr.vmem [resolvable:$false] %s1008_s23 }
  0x6b   : > { %s1010_s28 = scalar_lea.vmem %s1009_s23, 64  ;;  %p1011_p3 = scmp.lt.s32.totalorder %s1345_s25, %s1009_s23 }
  0x6c   : > { %p1006_p0 = pnand %p1005_p13, %p721_p7  ;;  %p1012_p6 = scmp.lt.s32.totalorder %s1010_s28, %s1004_s4 }
  0x6e   : > { %p1007_p2 = pneg %p1006_p0  ;;  %p1013_p1 = por %p1012_p6, %p1011_p3 }
  0x70   : > { %p1014_p4 = pnand %p1013_p1, %p1007_p2 }
  0x72   : > { %1017 = shalt.err (!%p1014_p4)
}
  0x73   : > { %218 = dma.hbm_to_vmem [thread:$0]  (%p721_p7), %s213_s12, %s1337_s5, %s1345_s25, %s1340_s27  }
  0x74 PF: > { %p723_p10 = scmp.ge.s32.totalorder %s1144_s19, 1  ;;  %p220_p5 = scmp.lt.s32.totalorder %s1144_s19, 5 }
  0x76   : > { %p221_p8 = pnand %p723_p10, %p220_p5 }
  0x77   : > { %s226_s21 = sand.u32 (!%p221_p8), 1, %s1120_s13  }
  0x78   : > { %224 = sbr.rel (%p221_p8) target bundleno = 451 (0x1c3), region = 28  ;;  %s724_s26 = sshll.u32 (!%p221_p8), %s226_s21, 6 }
  0x79   : > { %s227_s29 = scalar_lea.sflag (!%p221_p8), [#allocation3], %s226_s21  ;;  %s1373_s24 = scalar_lea.vmem (!%p221_p8), [#allocation2], %s724_s26 }
  0x7f   : > { %1091 = dma.done.wait (%p1255_p11), %s227_s29, 1024  }
  0x80   : > { %1093 = vsyncadd (%p1255_p11), %s227_s29, 4294966272  ;;  %s725_s5 = sshll.u32 %s226_s21, 1  ;;  %s236_s27 = scalar_lea.sflag [#allocation6], %s226_s21 }
  0x81   : > { %s239_s25 = scalar_lea.vmem [#allocation5], %s725_s5 }
  0x82   : > { %1095 = dma.done.wait (%p1255_p11), %s236_s27, 32  }
  0x83   : > { %1097 = vsyncadd (%p1255_p11), %s236_s27, 4294967264  ;;  %s262_s12 = sand.u32 1, %s1108_s10   ;;  %p727_p7 = scmp.ne.s32.totalorder %s1128_s15, 0 }
  0x84   : > { %s726_s30 = sshll.u32 %s262_s12, 5  ;;  %v1150_v0 = vmov (!%p727_p7), 0.0  }
  0x85   : > { %s1386_s20 = scalar_lea.vmem [#allocation7], %s726_s30  ;;  %287 = sbr.rel (%p727_p7) target bundleno = 140 (0x8c), region = 40 }
  0x86   : > { %288 = vst [vmem:[%s1386_s20] sm:$0xff] (!%p727_p7), %v1150_v0  ;;  %289 = vst [vmem:[%s1386_s20 + $0x8] sm:$0xff] (!%p727_p7), %v1150_v0 }
  0x87   : > { %290 = vst [vmem:[%s1386_s20 + $0x10] sm:$0xff] (!%p727_p7), %v1150_v0  ;;  %291 = vst [vmem:[%s1386_s20 + $0x18] sm:$0xff] (!%p727_p7), %v1150_v0 }
  0x8c PF: > { %v301_v1 = vlaneseq  ;;  %s728_s3 = sshll.u32 %s1128_s15, 8  ;;  %v300_v5 = vld [vmem:[%s239_s25] sm:$0x3]  ;;  %v293_v14 = vld [vmem:[%s1373_s24 + $0x8] sm:$0xff]  ;;  %v1151_v18 = vmov 1.0|1.0  }
  0x8d   : > { %v364_v4 = vstv %s728_s3  ;;  %v297_v15 = vld [vmem:[%s1373_s24 + $0x28] sm:$0xff]  ;;  %v292_v34 = vld [vmem:[%s1373_s24] sm:$0xff]  ;;  %v295_v36 = vld [vmem:[%s1373_s24 + $0x18] sm:$0xff]  ;;  %s808_s15 = sshll.u32 %s1132_s16, 9  ;;  %s589_s17 = sshll.u32 %s1386_s20, 4  ;;  %s1608_s17 = int_to_ptr.vmem [resolvable:$true] %s589_s17 }
  0x8e   : > { %v1394_v2 = vshrl.u32 %v301_v1, 7  ;;  %v362_v3 = vand.u32 127, %v301_v1  ;;  %v296_v35 = vld [vmem:[%s1373_s24 + $0x20] sm:$0xff]  ;;  %v299_v37 = vld [vmem:[%s1373_s24 + $0x38] sm:$0xff]  ;;  %v294_v38 = vld [vmem:[%s1373_s24 + $0x10] sm:$0xff]  ;;  %s1606_s4 = scalar_lea.hbm %s1677_s2, %s808_s15  ;;  %s1614_s16 = scalar_lea.sflag [#allocation4], %s262_s12 }
  0x8f   : > { %v298_v39 = vld [vmem:[%s1373_s24 + $0x30] sm:$0xff]  ;;  %v413_v40 = vld [vmem:[%s1386_s20] sm:$0xff]  ;;  %v416_v49 = vld [vmem:[%s1386_s20 + $0x18] sm:$0xff]  ;;  %s1018_s22 = scalar_lea.vmem %s1608_s17, 512  ;;  %p1699_p9 = scmp.ne.s32.totalorder %s1691_s7, 0 }
  0x90   : > { %v303_v6 = vadd.s32 8, %v1394_v2  ;;  %v324_v7 = vsub.s32 1, %v1394_v2  ;;  %v363_v8 = vadd.s32 128, %v362_v3  ;;  %v320_v9 = vsub.s32 0, %v1394_v2  ;;  %v415_v41 = vld [vmem:[%s1386_s20 + $0x10] sm:$0xff]  ;;  %v414_v48 = vld [vmem:[%s1386_s20 + $0x8] sm:$0xff]  ;;  %p1019_p11 = scmp.ne.s32.totalorder %s1608_s17, %s1018_s22 }
  0x91   : > { %v1399_v10 = vadd.s32 %v364_v4, %v362_v3  ;;  %v304_v16 = vadd.s32 16, %v1394_v2  ;;  %v305_v17 = vadd.s32 24, %v1394_v2  ;;  %v306_v19 = vadd.s32 32, %v1394_v2  ;;  %s1152_s23 = smov [#allocation7]  }
  0x92   : > { %v1401_v11 = vrot.slane %v300_v5, %v324_v7  ;;  %v1403_v12 = vadd.s32 %v364_v4, %v363_v8  ;;  %v1405_v13 = vrot.slane %v300_v5, %v320_v9  ;;  %v307_v20 = vadd.s32 40, %v1394_v2  ;;  %p1020_p12 = pnand %p1019_p11, %p1699_p9  ;;  %s1022_s28 = sshll.u32 %s1152_s23, 4  ;;  %s1023_s28 = int_to_ptr.vmem [resolvable:$false] %s1022_s28 }
  0x93   : > { %vm367_vm5 = vcmp.lt.s32.totalorder %v1399_v10, 324  ;;  %v308_v21 = vadd.s32 48, %v1394_v2  ;;  %v309_v22 = vadd.s32 56, %v1394_v2  ;;  %v310_v23 = vadd.s32 64, %v1394_v2  ;;  %s1024_s21 = scalar_lea.vmem %s1023_s28, 1024  ;;  %p1025_p0 = scmp.lt.s32.totalorder %s1608_s17, %s1023_s28 }
  0x94   : > { %vm327_vm0 = vcmp.eq.s32.totalorder %v1401_v11, %v1394_v2  ;;  %vm329_vm1 = vcmp.eq.s32.totalorder %v1401_v11, %v303_v6  ;;  %vm368_vm2 = vcmp.lt.s32.totalorder %v1403_v12, 324  ;;  %vm326_vm4 = vcmp.eq.s32.totalorder %v1405_v13, %v1394_v2  ;;  %p1021_p13 = pneg %p1020_p12  ;;  %p1026_p2 = scmp.lt.s32.totalorder %s1024_s21, %s1018_s22 }
  0x95   : > { %vm374_vm3 = vmand %vm327_vm0, %vm368_vm2  ;;  %793 = vmatprep.mubr.msk.f32.mxu0 %vm368_vm2, %v293_v14  ;;  %vm328_vm7 = vcmp.eq.s32.totalorder %v1405_v13, %v303_v6  ;;  %797 = vmatprep.mubr.msk.f32.mxu1 %vm368_vm2, %v297_v15  ;;  %vm331_vm10 = vcmp.eq.s32.totalorder %v1401_v11, %v304_v16  ;;  %vm333_vm12 = vcmp.eq.s32.totalorder %v1401_v11, %v305_v17  ;;  %v311_v24 = vadd.s32 72, %v1394_v2 }
  0x96   : > { %vm376_vm6 = vmand %vm329_vm1, %vm368_vm2  ;;  %vm330_vm15 = vcmp.eq.s32.totalorder %v1405_v13, %v304_v16  ;;  %vm332_vm1 = vcmp.eq.s32.totalorder %v1405_v13, %v305_v17  ;;  %v312_v26 = vadd.s32 80, %v1394_v2  ;;  %v313_v27 = vadd.s32 88, %v1394_v2  ;;  %p1027_p3 = por %p1026_p2, %p1025_p0 }
  0x97   : > { %vm809_vm8 = vmpackc.low %vm376_vm6, %vm374_vm3  ;;  %vm335_vm6 = vcmp.eq.s32.totalorder %v1401_v11, %v306_v19  ;;  %v314_v29 = vadd.s32 96, %v1394_v2  ;;  %v315_v30 = vadd.s32 104, %v1394_v2  ;;  %v316_v32 = vadd.s32 112, %v1394_v2 }
  0x98   : > { %810 = vmatprep.subr.msk.bf16.mxu0 %vm809_vm8, %v1151_v18  ;;  %841 = vmatprep.subr.msk.bf16.mxu1 %vm809_vm8, %v1151_v18  ;;  %vm373_vm9 = vmand %vm326_vm4, %vm367_vm5  ;;  %vm337_vm8 = vcmp.eq.s32.totalorder %v1401_v11, %v307_v20  ;;  %v317_v33 = vadd.s32 120, %v1394_v2  ;;  %p1028_p6 = pnand %p1027_p3, %p1021_p13 }
  0x99   : > { %vm375_vm11 = vmand %vm328_vm7, %vm367_vm5 }
  0x9a   : > { %vm811_vm13 = vmpackc.low %vm375_vm11, %vm373_vm9  ;;  %vm334_vm11 = vcmp.eq.s32.totalorder %v1405_v13, %v306_v19 }
  0x9b   : > { %812 = vmatpush1.bf16.xpose.msk.msra.mxu0 %vm811_vm13, %v1151_v18  ;;  %849 = vmatpush1.bf16.xpose.msk.msra.mxu1 %vm811_vm13, %v1151_v18  ;;  %vm378_vm14 = vmand %vm331_vm10, %vm368_vm2  ;;  %vm336_vm13 = vcmp.eq.s32.totalorder %v1405_v13, %v307_v20 }
  0x9c   : > { %vm380_vm0 = vmand %vm333_vm12, %vm368_vm2 }
  0x9d   : > { %vm813_vm3 = vmpackc.low %vm380_vm0, %vm378_vm14  ;;  %vm339_vm0 = vcmp.eq.s32.totalorder %v1401_v11, %v308_v21 }
  0x9e   : > { %814 = vmatprep.subr.msk.bf16.mxu0 %vm813_vm3, %v1151_v18  ;;  %842 = vmatprep.subr.msk.bf16.mxu1 %vm813_vm3, %v1151_v18  ;;  %vm377_vm4 = vmand %vm330_vm15, %vm367_vm5  ;;  %vm341_vm3 = vcmp.eq.s32.totalorder %v1401_v11, %v309_v22 }
  0x9f   : > { %vm379_vm7 = vmand %vm332_vm1, %vm367_vm5 }
  0xa0   : > { %vm815_vm9 = vmpackc.low %vm379_vm7, %vm377_vm4 }
  0xa1   : > { %vm382_vm10 = vmand %vm335_vm6, %vm368_vm2 }
  0xa2   : > { %vm384_vm12 = vmand %vm337_vm8, %vm368_vm2  ;;  %vm338_vm8 = vcmp.eq.s32.totalorder %v1405_v13, %v308_v21 }
  0xa3   : > { %816 = vmatpush1.bf16.xpose.msk.msra.mxu0 %vm815_vm9, %v1151_v18  ;;  %850 = vmatpush1.bf16.xpose.msk.msra.mxu1 %vm815_vm9, %v1151_v18  ;;  %vm817_vm14 = vmpackc.low %vm384_vm12, %vm382_vm10  ;;  %vm340_vm10 = vcmp.eq.s32.totalorder %v1405_v13, %v309_v22 }
  0xa4   : > { %818 = vmatprep.subr.msk.bf16.mxu0 %vm817_vm14, %v1151_v18  ;;  %843 = vmatprep.subr.msk.bf16.mxu1 %vm817_vm14, %v1151_v18  ;;  %vm381_vm15 = vmand %vm334_vm11, %vm367_vm5  ;;  %vm343_vm11 = vcmp.eq.s32.totalorder %v1401_v11, %v310_v23 }
  0xa5   : > { %vm383_vm1 = vmand %vm336_vm13, %vm367_vm5  ;;  %vm345_vm13 = vcmp.eq.s32.totalorder %v1401_v11, %v311_v24 }
  0xa6   : > { %vm819_vm4 = vmpackc.low %vm383_vm1, %vm381_vm15 }
  0xa7   : > { %vm386_vm6 = vmand %vm339_vm0, %vm368_vm2 }
  0xa8   : > { %vm388_vm7 = vmand %vm341_vm3, %vm368_vm2  ;;  %vm342_vm3 = vcmp.eq.s32.totalorder %v1405_v13, %v310_v23 }
  0xa9   : > { %vm821_vm9 = vmpackc.low %vm388_vm7, %vm386_vm6  ;;  %vm344_vm6 = vcmp.eq.s32.totalorder %v1405_v13, %v311_v24  ;;  %vm347_vm7 = vcmp.eq.s32.totalorder %v1401_v11, %v312_v26 }
  0xaa   : > { %vm1484_vm12 = vmand %vm338_vm8, %vm367_vm5 }
  0xab   : > { %820 = vmatpush1.bf16.xpose.msk.msra.mxu0 %vm819_vm4, %v1151_v18  ;;  %851 = vmatpush1.bf16.xpose.msk.msra.mxu1 %vm819_vm4, %v1151_v18  ;;  %vm387_vm14 = vmand %vm340_vm10, %vm367_vm5 }
  0xac   : > { %822 = vmatprep.subr.msk.bf16.mxu0 %vm821_vm9, %v1151_v18  ;;  %844 = vmatprep.subr.msk.bf16.mxu1 %vm821_vm9, %v1151_v18  ;;  %vm390_vm15 = vmand %vm343_vm11, %vm368_vm2  ;;  %vm349_vm9 = vcmp.eq.s32.totalorder %v1401_v11, %v313_v27 }
  0xad   : > { %vm392_vm0 = vmand %vm345_vm13, %vm368_vm2 }
  0xae   : > { %vm823_vm1 = vmpackc.low %vm387_vm14, %vm1484_vm12  ;;  %vm346_vm14 = vcmp.eq.s32.totalorder %v1405_v13, %v312_v26 }
  0xaf   : > { %vm825_vm4 = vmpackc.low %vm392_vm0, %vm390_vm15  ;;  %vm348_vm0 = vcmp.eq.s32.totalorder %v1405_v13, %v313_v27 }
  0xb0   : > { %vm1508_vm8 = vmand %vm342_vm3, %vm367_vm5 }
  0xb1   : > { %vm391_vm10 = vmand %vm344_vm6, %vm367_vm5 }
  0xb2   : > { %vm394_vm11 = vmand %vm347_vm7, %vm368_vm2 }
  0xb3   : > { %824 = vmatpush1.bf16.xpose.msk.msra.mxu0 %vm823_vm1, %v1151_v18  ;;  %852 = vmatpush1.bf16.xpose.msk.msra.mxu1 %vm823_vm1, %v1151_v18  ;;  %vm396_vm12 = vmand %vm349_vm9, %vm368_vm2  ;;  %vm351_vm1 = vcmp.eq.s32.totalorder %v1401_v11, %v314_v29 }
  0xb4   : > { %826 = vmatprep.subr.msk.bf16.mxu0 %vm825_vm4, %v1151_v18  ;;  %845 = vmatprep.subr.msk.bf16.mxu1 %vm825_vm4, %v1151_v18  ;;  %vm827_vm13 = vmpackc.low %vm391_vm10, %vm1508_vm8  ;;  %vm353_vm4 = vcmp.eq.s32.totalorder %v1401_v11, %v315_v30  ;;  %vm350_vm10 = vcmp.eq.s32.totalorder %v1405_v13, %v314_v29 }
  0xb5   : > { %vm829_vm15 = vmpackc.low %vm396_vm12, %vm394_vm11  ;;  %vm352_vm12 = vcmp.eq.s32.totalorder %v1405_v13, %v315_v30 }
  0xb6   : > { %vm1532_vm3 = vmand %vm346_vm14, %vm367_vm5 }
  0xb7   : > { %vm395_vm6 = vmand %vm348_vm0, %vm367_vm5 }
  0xb8   : > { %vm398_vm7 = vmand %vm351_vm1, %vm368_vm2 }
  0xb9   : > { %vm400_vm8 = vmand %vm353_vm4, %vm368_vm2 }
  0xba   : > { %vm831_vm9 = vmpackc.low %vm395_vm6, %vm1532_vm3 }
  0xbb   : > { %828 = vmatpush1.bf16.xpose.msk.msra.mxu0 %vm827_vm13, %v1151_v18  ;;  %853 = vmatpush1.bf16.xpose.msk.msra.mxu1 %vm827_vm13, %v1151_v18  ;;  %vm833_vm11 = vmpackc.low %vm400_vm8, %vm398_vm7  ;;  %vm355_vm13 = vcmp.eq.s32.totalorder %v1401_v11, %v316_v32  ;;  %vm354_vm7 = vcmp.eq.s32.totalorder %v1405_v13, %v316_v32  ;;  %vm356_vm8 = vcmp.eq.s32.totalorder %v1405_v13, %v317_v33 }
  0xbc   : > { %830 = vmatprep.subr.msk.bf16.mxu0 %vm829_vm15, %v1151_v18  ;;  %846 = vmatprep.subr.msk.bf16.mxu1 %vm829_vm15, %v1151_v18  ;;  %vm397_vm14 = vmand %vm350_vm10, %vm367_vm5  ;;  %vm357_vm15 = vcmp.eq.s32.totalorder %v1401_v11, %v317_v33 }
  0xbd   : > { %vm399_vm0 = vmand %vm352_vm12, %vm367_vm5 }
  0xbe   : > { %vm402_vm1 = vmand %vm355_vm13, %vm368_vm2 }
  0xbf   : > { %vm404_vm3 = vmand %vm357_vm15, %vm368_vm2 }
  0xc0   : > { %vm835_vm4 = vmpackc.low %vm399_vm0, %vm397_vm14 }
  0xc1   : > { %vm837_vm6 = vmpackc.low %vm404_vm3, %vm402_vm1 }
  0xc2   : > { %vm403_vm10 = vmand %vm356_vm8, %vm367_vm5 }
  0xc3   : > { %832 = vmatpush1.bf16.xpose.msk.msra.mxu0 %vm831_vm9, %v1151_v18  ;;  %854 = vmatpush1.bf16.xpose.msk.msra.mxu1 %vm831_vm9, %v1151_v18  ;;  %vm401_vm9 = vmand %vm354_vm7, %vm367_vm5 }
  0xc4   : > { %834 = vmatprep.subr.msk.bf16.mxu0 %vm833_vm11, %v1151_v18  ;;  %847 = vmatprep.subr.msk.bf16.mxu1 %vm833_vm11, %v1151_v18  ;;  %vm839_vm11 = vmpackc.low %vm403_vm10, %vm401_vm9 }
  0xcb   : > { %836 = vmatpush1.bf16.xpose.msk.msra.mxu0 %vm835_vm4, %v1151_v18  ;;  %855 = vmatpush1.bf16.xpose.msk.msra.mxu1 %vm835_vm4, %v1151_v18 }
  0xcc   : > { %838 = vmatprep.subr.msk.bf16.mxu0 %vm837_vm6, %v1151_v18  ;;  %848 = vmatprep.subr.msk.bf16.mxu1 %vm837_vm6, %v1151_v18 }
  0xd3   : > { %840 = vmatpush1.bf16.xpose.msk.msra.mxu0 %vm839_vm11, %v1151_v18  ;;  %856 = vmatpush1.bf16.xpose.msk.msra.mxu1 %vm839_vm11, %v1151_v18 }
  0xda   : > { %794 = vmatmul.mubr.msk.f32.vlgmr.msra.gmra.mrb[0].mxu0 %vm367_vm5, %v292_v34  ;;  %798 = vmatmul.mubr.msk.f32.vlgmr.msra.gmra.mrb[0].mxu1 %vm367_vm5, %v296_v35 }
  0xdb   : > { %795 = vmatprep.mubr.msk.f32.mxu0 %vm368_vm2, %v295_v36  ;;  %799 = vmatprep.mubr.msk.f32.mxu1 %vm368_vm2, %v299_v37 }
  0xde   : > { %796 = vmatmul.mubr.msk.f32.gmra.mrb[2].mxu0 %vm367_vm5, %v294_v38  ;;  %800 = vmatmul.mubr.msk.f32.gmra.mrb[2].mxu1 %vm367_vm5, %v298_v39 }
 0x1ad   : > { %v547_v42 = vpop.f32.mrb[0].mxu0  ;;  %v557_v43 = vpop.f32.mrb[0].mxu1 }
 0x1ae   : > { %v566_v44 = vadd.f32 %v547_v42, %v413_v40  ;;  %v568_v45 = vadd.f32 %v557_v43, %v415_v41  ;;  %v549_v46 = vpop.f32.mrb[1].mxu0  ;;  %v559_v47 = vpop.f32.mrb[1].mxu1 }
 0x1b0   : > { %570 = vst [vmem:[%s1386_s20] sm:$0xff] %v566_v44  ;;  %572 = vst [vmem:[%s1386_s20 + $0x10] sm:$0xff] %v568_v45 }
 0x1b1   : > { %v552_v50 = vpop.f32.mrb[2].mxu0  ;;  %v562_v51 = vpop.f32.mrb[2].mxu1 }
 0x1b2   : > { %v567_v52 = vadd.f32 %v552_v50, %v414_v48  ;;  %v569_v53 = vadd.f32 %v562_v51, %v416_v49  ;;  %v554_v54 = vpop.f32.mrb[3].mxu0  ;;  %v564_v55 = vpop.f32.mrb[3].mxu1 }
 0x1b4   : > { %571 = vst [vmem:[%s1386_s20 + $0x8] sm:$0xff] %v567_v52  ;;  %573 = vst [vmem:[%s1386_s20 + $0x18] sm:$0xff] %v569_v53 }
 0x1b5   : > { %1031 = shalt.err (!%p1028_p6)
}
 0x1b6   : > { %s1032_s26 = scalar_lea.hbm %s1606_s4, 512  ;;  %s1036_s5 = scalar_lea.hbm %s1677_s2, 1024 }
 0x1b7   : > { %p1033_p1 = scmp.ne.s32.totalorder %s1606_s4, %s1032_s26  ;;  %p1037_p5 = scmp.lt.u32.totalorder %s1606_s4, %s1677_s2 }
 0x1b8   : > { %p1038_p8 = scmp.lt.u32.totalorder %s1036_s5, %s1032_s26  ;;  %p1040_p11 = scmp.lt.u32.totalorder %s1032_s26, %s1606_s4 }
 0x1b9   : > { %p1034_p4 = pnand %p1033_p1, %p1699_p9 }
 0x1ba   : > { %p1039_p7 = por %p1038_p8, %p1037_p5 }
 0x1bb   : > { %p1035_p10 = pneg %p1034_p4 }
 0x1bc   : > { %p1041_p12 = por %p1040_p11, %p1039_p7 }
 0x1be   : > { %p1042_p13 = pnand %p1041_p12, %p1035_p10 }
 0x1c0   : > { %1045 = shalt.err (!%p1042_p13)
}
 0x1c1   : > { %s1153_s12 = smov 128   ;;  %s1154_s30 = smov 8  }
 0x1c2   : > { %861 = dma.vmem_to_hbm [thread:$0]  (%p1699_p9), %s1608_s17, 512, %s1606_s4, %s1614_s16, %s1153_s12, %s1153_s12, %s1154_s30  }
 0x1c3 PF: > { %p867_p0 = scmp.ge.s32.totalorder %s1144_s19, 2  ;;  %s604_s20 = sand.u32 1, %s1104_s9  }
 0x1c4   : > { %p1700_p2 = scmp.ne.s32.totalorder %s1692_s8, 0  ;;  %s605_s3 = scalar_lea.sflag [#allocation4], %s604_s20 }
 0x1c6   : > { %p864_p3 = pnand %p867_p0, %p1700_p2 }
 0x1c8   : > { %1099 = dma.done.wait (!%p864_p3), %s605_s3, 512  }
 0x1c9   : > { %1101 = vsyncadd (!%p864_p3), %s605_s3, 4294966784  ;;  %s21_s19 = sadd.s32 1, %s1144_s19   ;;  %s1701_s15 = sld [smem:[#allocation11_spill]] }
 0x1ca   : > { %p18_p6 = scmp.ge.s32.totalorder %s21_s19, 6   ;;  %s1702_s11 = sld [smem:[#allocation16_spill]] }
 0x1cb   : > { %s1703_s7 = sld [smem:[#allocation15_spill]]  ;;  %s1704_s17 = sld [smem:[#allocation12_spill]] }
 0x1cc   : > { %s1705_s6 = sld [smem:[#allocation13_spill]]  ;;  %s1706_s4 = sld [smem:[#allocation14_spill]] }
 0x1cd   : > { %s1707_s9 = smov %s1108_s10  ;;  %s1709_s12 = smov %s1120_s13 }
 0x1ce   : > { %s1710_s13 = smov %s1124_s14  ;;  %s1713_s16 = smov %s1140_s18 }
 0x1cf   : > { %s1708_s10 = smov %s1701_s15  ;;  %20 = sbr.rel (!%p18_p6) target bundleno = 11 (0xb), region = 90 }
 0x1d1   : > { %s1711_s14 = smov %s1703_s7  ;;  %s1712_s15 = smov %s1704_s17 }
 0x1d2   : > { %s1714_s17 = smov %s1705_s6  ;;  %s1715_s18 = smov %s1706_s4 }
 0x1d6   :  { %610 = vsyncpa [#allocation3], 1 }
 0x1d7   :  { %612 = vsyncpa [#allocation3 + $0x1], 1 }
 0x1d8   :  { %613 = vsyncpa [#allocation6], 1 }
 0x1d9   :  { %615 = vsyncpa [#allocation6 + $0x1], 1 }
 0x1da   :  { %616 = vsyncpa [#allocation4], 1 }
 0x1db   :  { %618 = vsyncpa [#allocation4 + $0x1], 1 }

</bundles_post_ra>
